<compile_context>
chip_gen: v5e
topology: v5e:2x2
jax: 0.10.0
libtpu: 0.0.40
codegen_flags: <defaults>
</compile_context>

<pallas_src>
import functools

import jax
import jax.numpy as jnp
from jax.experimental import pallas as pl
from jax.experimental.pallas import tpu as pltpu


def _round_up(x, m):
    return ((x + m - 1) // m) * m


# ----------------------------------------------------------------------------- kernel
def _posterior_kernel(stoch_ref, deter_ref, obs_ref, eps_ref,        # activations [TB, *] (bf16)
                      w1s_ref, w1d_ref, w1o_ref, b1_ref,              # layer 1 (bf16 W, f32 b)
                      w2_ref, b2_ref,                                  # layer 2 (bf16 W, f32 b)
                      out_ref,                                         # packed [TB, 3*S_pad] bf16
                      *, s_pad):
    # hidden = ELU(cat(stoch, deter, obs) @ W1 + b1); W1 pre-split row-wise so the
    # concat never materializes.  bf16 operands, f32 accumulation.
    h = (jnp.dot(stoch_ref[...], w1s_ref[...], preferred_element_type=jnp.float32)
         + jnp.dot(deter_ref[...], w1d_ref[...], preferred_element_type=jnp.float32)
         + jnp.dot(obs_ref[...], w1o_ref[...], preferred_element_type=jnp.float32)
         + b1_ref[...])
    # ELU(alpha=1): exp only on the non-positive side (avoids inf on the dead branch).
    h = jnp.where(h > 0.0, h, jnp.exp(jnp.minimum(h, 0.0)) - 1.0)

    # Fused second layer: columns [0:s_pad] = mean, [s_pad:2*s_pad] = raw std.
    ms = jnp.dot(h.astype(jnp.bfloat16), w2_ref[...],
                 preferred_element_type=jnp.float32) + b2_ref[...]
    mean = ms[:, :s_pad]
    std_raw = ms[:, s_pad:]

    # std = softplus(raw) + 0.1 (numerically stable form), all in f32.
    std = jnp.maximum(std_raw, 0.0) + jnp.log1p(jnp.exp(-jnp.abs(std_raw))) + 0.1

    # rsample of Independent(Normal(mean, std), 1): mean + std * eps, eps ~ N(0, 1).
    stoch = mean + std * eps_ref[...].astype(jnp.float32)

    # Lane-dense packed bf16 output: [mean | std | stoch], each 128-aligned.
    out_ref[:, :s_pad] = mean.astype(out_ref.dtype)
    out_ref[:, s_pad:2 * s_pad] = std.astype(out_ref.dtype)
    out_ref[:, 2 * s_pad:] = stoch.astype(out_ref.dtype)


# ----------------------------------------------------------------------------- wrapper
def _choose_batch_tile(batch, tb_req, min_grid=2):
    """Batch tile: multiple of 8, keeps >= min_grid grid steps when the batch allows
    (v7x megacore), and prefers a tile that divides the batch exactly so the
    wrapper-side jnp.pad copy is skipped."""
    tb_req = max(8, int(tb_req))
    cap = max(8, _round_up(-(-batch // min_grid), 8))          # cdiv, rounded to 8
    tb = min(_round_up(min(tb_req, batch), 8), cap)
    if batch % 8 == 0:
        t = tb
        while t >= 8 and batch % t != 0:
            t -= 8
        if t >= 8:
            tb = t
    return tb


def _posterior_pallas(stoch, deter, obs_embed,
                      w1_s, w1_d, w1_o, b1, w2, b2,
                      *, key, s_pad, tb=512):
    B, S = stoch.shape
    Dd = deter.shape[1]
    E = obs_embed.shape[1]
    Hp = w1_s.shape[1]

    tb = _choose_batch_tile(B, tb)
    b_pad = _round_up(B, tb)
    if b_pad != B:  # only when no multiple-of-8 tile divides B
        padfn = lambda a: jnp.pad(a, ((0, b_pad - B), (0, 0)))
        stoch, deter, obs_embed = padfn(stoch), padfn(deter), padfn(obs_embed)
    nb = b_pad // tb
    out_w = 3 * s_pad

    # eps ~ N(0, 1), bf16, generated directly at the padded lane-dense shape.
    eps = jax.random.normal(key, (b_pad, s_pad), dtype=jnp.bfloat16)

    def act_spec(feat):
        return pl.BlockSpec((tb, feat), lambda i: (i, 0))

    def const_spec(shape):
        return pl.BlockSpec(shape, lambda i: (0,) * len(shape))

    grid_spec = pltpu.PrefetchScalarGridSpec(
        num_scalar_prefetch=0,
        grid=(nb,),
        in_specs=[
            act_spec(S), act_spec(Dd), act_spec(E), act_spec(s_pad),
            const_spec(w1_s.shape), const_spec(w1_d.shape), const_spec(w1_o.shape),
            const_spec(b1.shape), const_spec(w2.shape), const_spec(b2.shape),
        ],
        out_specs=pl.BlockSpec((tb, out_w), lambda i: (i, 0)),
    )

    flops = 2 * b_pad * ((S + Dd + E) * Hp + Hp * 2 * s_pad)
    transcendentals = b_pad * (Hp + 2 * s_pad)                 # ELU exp + softplus exp/log1p
    bytes_accessed = (2 * b_pad * (S + Dd + E + s_pad)         # bf16 activations + eps
                      + 2 * (w1_s.size + w1_d.size + w1_o.size + w2.size)  # bf16 weights
                      + 4 * (b1.size + b2.size)                # f32 biases
                      + 2 * b_pad * out_w)                     # bf16 packed output

    kernel = functools.partial(_posterior_kernel, s_pad=s_pad)
    out = pl.pallas_call(
        kernel,
        out_shape=jax.ShapeDtypeStruct((b_pad, out_w), jnp.bfloat16),
        grid_spec=grid_spec,
        compiler_params=pltpu.CompilerParams(
            dimension_semantics=("parallel",),
            vmem_limit_bytes=32 * 1024 * 1024),
        cost_estimate=pl.CostEstimate(
            flops=int(flops),
            transcendentals=int(transcendentals),
            bytes_accessed=int(bytes_accessed)),
    )(stoch, deter, obs_embed, eps, w1_s, w1_d, w1_o, b1, w2, b2)

    mean = out[:B, :S].astype(jnp.float32)
    std = out[:B, s_pad:s_pad + S].astype(jnp.float32)
    stoch_sample = out[:B, 2 * s_pad:2 * s_pad + S].astype(jnp.float32)
    return mean, std, stoch_sample


# ----------------------------------------------------------------------------- module
class RepresentationModelPallas:
    def __init__(self, obs_embed_size, action_size, stochastic_size=30,
                 deterministic_size=200, hidden_size=200, key=None):
        self._obs_embed_size = obs_embed_size
        self._action_size = action_size
        self._stoch_size = stochastic_size
        self._deter_size = deterministic_size
        self._hidden_size = hidden_size
        self._h_pad = _round_up(hidden_size, 128)
        self._s_pad = _round_up(stochastic_size, 128)

        in_size = deterministic_size + stochastic_size + obs_embed_size
        if key is None:
            key = jax.random.PRNGKey(42)
        k1, k2, k3, k4 = jax.random.split(key, 4)

        # nn.Linear-style init (uniform +-1/sqrt(fan_in)); weights stored as [in, out].
        bnd1 = in_size ** -0.5
        w1 = jax.random.uniform(k1, (in_size, hidden_size), jnp.float32, -bnd1, bnd1)
        b1 = jax.random.uniform(k2, (1, hidden_size), jnp.float32, -bnd1, bnd1)
        bnd2 = hidden_size ** -0.5
        w2 = jax.random.uniform(k3, (hidden_size, 2 * stochastic_size), jnp.float32, -bnd2, bnd2)
        b2 = jax.random.uniform(k4, (1, 2 * stochastic_size), jnp.float32, -bnd2, bnd2)

        S, Dd, H = stochastic_size, deterministic_size, hidden_size
        Hp, Sp = self._h_pad, self._s_pad

        def pad_cols(a, width):
            return jnp.pad(a, ((0, 0), (0, width - a.shape[1])))

        # W1 split row-wise to match cat([stoch, deter, obs_embed], -1);
        # columns zero-padded to H_pad, stored bf16 (matmul operands).
        self.w1_s = pad_cols(w1[:S], Hp).astype(jnp.bfloat16)
        self.w1_d = pad_cols(w1[S:S + Dd], Hp).astype(jnp.bfloat16)
        self.w1_o = pad_cols(w1[S + Dd:], Hp).astype(jnp.bfloat16)
        self.b1 = pad_cols(b1, Hp)  # f32 (added after f32 accumulation)

        # Fused, lane-aligned second layer: cols [0:S] = mean, [Sp:Sp+S] = std-raw,
        # all padding zero so the wrapper slice is exact.
        w2p = jnp.zeros((Hp, 2 * Sp), jnp.float32)
        w2p = w2p.at[:H, :S].set(w2[:, :S])
        w2p = w2p.at[:H, Sp:Sp + S].set(w2[:, S:])
        self.w2 = w2p.astype(jnp.bfloat16)
        b2p = jnp.zeros((1, 2 * Sp), jnp.float32)
        b2p = b2p.at[:, :S].set(b2[:, :S])
        b2p = b2p.at[:, Sp:Sp + S].set(b2[:, S:])
        self.b2 = b2p

    def initial_state(self, batch_size, dtype=jnp.float32):
        z = lambda n: jnp.zeros((batch_size, n), dtype)
        return dict(mean=z(self._stoch_size), std=z(self._stoch_size),
                    stoch=z(self._stoch_size), deter=z(self._deter_size))

    def forward(self, obs_embed, prev_action, prev_state, is_init=False,
                transition_model=None, sample_seed=0, tile_batch=512):
        if is_init:
            prior_state = prev_state
        else:
            prior_state = transition_model(prev_action, prev_state)

        mean, std, stoch = _posterior_pallas(
            prior_state['stoch'].astype(jnp.bfloat16),
            prior_state['deter'].astype(jnp.bfloat16),
            obs_embed.astype(jnp.bfloat16),
            self.w1_s, self.w1_d, self.w1_o, self.b1, self.w2, self.b2,
            key=jax.random.PRNGKey(sample_seed),
            s_pad=self._s_pad, tb=tile_batch)

        posterior_state = dict(mean=mean, std=std, stoch=stoch,
                               deter=prior_state['deter'])
        return prior_state, posterior_state


# ----------------------------------------------------------------------------- main
if __name__ == "__main__":
    batch = 64
    obs_embed_size = 32
    action_size = 4
    stoch_size = 16
    deter_size = 32
    hidden_size = 32

    key = jax.random.PRNGKey(0)
    k_obs, k_act, k_stoch, k_deter, k_params = jax.random.split(key, 5)

    model = RepresentationModelPallas(
        obs_embed_size, action_size,
        stochastic_size=stoch_size, deterministic_size=deter_size,
        hidden_size=hidden_size, key=k_params)

    obs_embed = jax.random.normal(k_obs, (batch, obs_embed_size), jnp.float32)
    prev_action = jax.random.normal(k_act, (batch, action_size), jnp.float32)
    prev_state = dict(
        mean=jnp.zeros((batch, stoch_size), jnp.float32),
        std=jnp.zeros((batch, stoch_size), jnp.float32),
        stoch=jax.random.normal(k_stoch, (batch, stoch_size), jnp.float32),
        deter=jax.random.normal(k_deter, (batch, deter_size), jnp.float32),
    )

    # Default tile policy -> tb=32, grid=(2,): exercises the batch-tiled pipeline.
    prior_state, posterior_state = model.forward(
        obs_embed, prev_action, prev_state, is_init=True, sample_seed=1234)
    jax.block_until_ready(posterior_state['stoch'])

    # Pure-JAX reference with the same bf16-operand / f32-accumulate policy.
    xs = prev_state['stoch'].astype(jnp.bfloat16)
    xd = prev_state['deter'].astype(jnp.bfloat16)
    xo = obs_embed.astype(jnp.bfloat16)
    h_ref = (jnp.dot(xs, model.w1_s, preferred_element_type=jnp.float32)
             + jnp.dot(xd, model.w1_d, preferred_element_type=jnp.float32)
             + jnp.dot(xo, model.w1_o, preferred_element_type=jnp.float32)
             + model.b1)
    h_ref = jnp.where(h_ref > 0.0, h_ref, jnp.exp(jnp.minimum(h_ref, 0.0)) - 1.0)
    ms_ref = jnp.dot(h_ref.astype(jnp.bfloat16), model.w2,
                     preferred_element_type=jnp.float32) + model.b2
    Sp = model._s_pad
    mean_ref = ms_ref[:, :stoch_size]
    std_ref = jax.nn.softplus(ms_ref[:, Sp:Sp + stoch_size]) + 0.1

    assert posterior_state['mean'].shape == (batch, stoch_size)
    assert posterior_state['std'].shape == (batch, stoch_size)
    assert posterior_state['stoch'].shape == (batch, stoch_size)
    assert posterior_state['deter'].shape == (batch, deter_size)
    # bf16 output slab -> compare with bf16-level tolerance.
    assert jnp.allclose(posterior_state['mean'], mean_ref, atol=2e-2, rtol=2e-2)
    assert jnp.allclose(posterior_state['std'], std_ref, atol=2e-2, rtol=2e-2)
    assert bool(jnp.all(posterior_state['std'] > 0.095))

    # stoch = mean + std * eps with eps ~ N(0, 1); check recovered eps statistics.
    eps_rec = (posterior_state['stoch'] - mean_ref) / std_ref
    assert bool(jnp.all(jnp.isfinite(eps_rec)))
    assert abs(float(jnp.mean(eps_rec))) < 0.5
    assert 0.5 < float(jnp.std(eps_rec)) < 1.5

    print("KERNEL_OK")
</pallas_src>

<mosaic_0001>
module attributes {stable_mosaic.version = 11 : i64} {
  func.func @_posterior_kernel(%arg0: i32, %arg1: memref<32x16xbf16, #tpu.memory_space<vmem>>, %arg2: memref<32x32xbf16, #tpu.memory_space<vmem>>, %arg3: memref<32x32xbf16, #tpu.memory_space<vmem>>, %arg4: memref<32x128xbf16, #tpu.memory_space<vmem>>, %arg5: memref<16x128xbf16, #tpu.memory_space<vmem>>, %arg6: memref<32x128xbf16, #tpu.memory_space<vmem>>, %arg7: memref<32x128xbf16, #tpu.memory_space<vmem>>, %arg8: memref<1x128xf32, #tpu.memory_space<vmem>>, %arg9: memref<128x256xbf16, #tpu.memory_space<vmem>>, %arg10: memref<1x256xf32, #tpu.memory_space<vmem>>, %arg11: memref<32x384xbf16, #tpu.memory_space<vmem>>) attributes {dimension_semantics = [#tpu.dimension_semantics<parallel>], iteration_bounds = array<i64: 2>, scalar_prefetch = 0 : i64, scratch_operands = 0 : i64, tpu.core_type = #tpu.core_type<tc>, window_params = [{transform_indices = @transform_0, window_bounds = array<i64: 32, 16>}, {transform_indices = @transform_1, window_bounds = array<i64: 32, 32>}, {transform_indices = @transform_2, window_bounds = array<i64: 32, 32>}, {transform_indices = @transform_3, window_bounds = array<i64: 32, 128>}, {pipeline_mode = #tpu.pipeline_mode<synchronous>, transform_indices = @transform_4, window_bounds = array<i64: 16, 128>}, {pipeline_mode = #tpu.pipeline_mode<synchronous>, transform_indices = @transform_5, window_bounds = array<i64: 32, 128>}, {pipeline_mode = #tpu.pipeline_mode<synchronous>, transform_indices = @transform_6, window_bounds = array<i64: 32, 128>}, {pipeline_mode = #tpu.pipeline_mode<synchronous>, transform_indices = @transform_7, window_bounds = array<i64: 1, 128>}, {pipeline_mode = #tpu.pipeline_mode<synchronous>, transform_indices = @transform_8, window_bounds = array<i64: 128, 256>}, {pipeline_mode = #tpu.pipeline_mode<synchronous>, transform_indices = @transform_9, window_bounds = array<i64: 1, 256>}, {transform_indices = @transform_10, window_bounds = array<i64: 32, 384>}]} {
    %c0 = arith.constant 0 : index
    %c0_0 = arith.constant 0 : index
    %0 = vector.load %arg1[%c0, %c0_0] : memref<32x16xbf16, #tpu.memory_space<vmem>>, vector<32x16xbf16>
    %c0_1 = arith.constant 0 : index
    %c0_2 = arith.constant 0 : index
    %1 = vector.load %arg5[%c0_1, %c0_2] : memref<16x128xbf16, #tpu.memory_space<vmem>>, vector<16x128xbf16>
    %cst = arith.constant dense<0.000000e+00> : vector<32x128xf32>
    %2 = tpu.matmul %0, %1, %cst {dimension_numbers = #tpu.dot_dimension_numbers<[1], [0], [0], [1], [0, 0, 1, 1], [], []>} : vector<32x16xbf16>, vector<16x128xbf16>, vector<32x128xf32> -> vector<32x128xf32>
    %c0_3 = arith.constant 0 : index
    %c0_4 = arith.constant 0 : index
    %3 = vector.load %arg2[%c0_3, %c0_4] : memref<32x32xbf16, #tpu.memory_space<vmem>>, vector<32x32xbf16>
    %c0_5 = arith.constant 0 : index
    %c0_6 = arith.constant 0 : index
    %4 = vector.load %arg6[%c0_5, %c0_6] : memref<32x128xbf16, #tpu.memory_space<vmem>>, vector<32x128xbf16>
    %cst_7 = arith.constant dense<0.000000e+00> : vector<32x128xf32>
    %5 = tpu.matmul %3, %4, %cst_7 {dimension_numbers = #tpu.dot_dimension_numbers<[1], [0], [0], [1], [0, 0, 1, 1], [], []>} : vector<32x32xbf16>, vector<32x128xbf16>, vector<32x128xf32> -> vector<32x128xf32>
    %6 = arith.addf %2, %5 : vector<32x128xf32>
    %c0_8 = arith.constant 0 : index
    %c0_9 = arith.constant 0 : index
    %7 = vector.load %arg3[%c0_8, %c0_9] : memref<32x32xbf16, #tpu.memory_space<vmem>>, vector<32x32xbf16>
    %c0_10 = arith.constant 0 : index
    %c0_11 = arith.constant 0 : index
    %8 = vector.load %arg7[%c0_10, %c0_11] : memref<32x128xbf16, #tpu.memory_space<vmem>>, vector<32x128xbf16>
    %cst_12 = arith.constant dense<0.000000e+00> : vector<32x128xf32>
    %9 = tpu.matmul %7, %8, %cst_12 {dimension_numbers = #tpu.dot_dimension_numbers<[1], [0], [0], [1], [0, 0, 1, 1], [], []>} : vector<32x32xbf16>, vector<32x128xbf16>, vector<32x128xf32> -> vector<32x128xf32>
    %10 = arith.addf %6, %9 : vector<32x128xf32>
    %c0_13 = arith.constant 0 : index
    %c0_14 = arith.constant 0 : index
    %11 = vector.load %arg8[%c0_13, %c0_14] : memref<1x128xf32, #tpu.memory_space<vmem>>, vector<1x128xf32>
    %12 = vector.broadcast %11 : vector<1x128xf32> to vector<32x128xf32>
    %13 = arith.addf %10, %12 : vector<32x128xf32>
    %cst_15 = arith.constant 0.000000e+00 : f32
    %14 = vector.broadcast %cst_15 : f32 to vector<32x128xf32>
    %15 = arith.cmpf ogt, %13, %14 : vector<32x128xf32>
    %cst_16 = arith.constant 0.000000e+00 : f32
    %16 = vector.broadcast %cst_16 : f32 to vector<32x128xf32>
    %17 = arith.minimumf %13, %16 : vector<32x128xf32>
    %18 = math.exp %17 : vector<32x128xf32>
    %cst_17 = arith.constant 1.000000e+00 : f32
    %19 = vector.broadcast %cst_17 : f32 to vector<32x128xf32>
    %20 = arith.subf %18, %19 : vector<32x128xf32>
    %21 = arith.select %15, %13, %20 : vector<32x128xi1>, vector<32x128xf32>
    %22 = arith.truncf %21 : vector<32x128xf32> to vector<32x128xbf16>
    %c0_18 = arith.constant 0 : index
    %c0_19 = arith.constant 0 : index
    %23 = vector.load %arg9[%c0_18, %c0_19] : memref<128x256xbf16, #tpu.memory_space<vmem>>, vector<128x256xbf16>
    %cst_20 = arith.constant dense<0.000000e+00> : vector<32x256xf32>
    %24 = tpu.matmul %22, %23, %cst_20 {dimension_numbers = #tpu.dot_dimension_numbers<[1], [0], [0], [1], [0, 0, 1, 1], [], []>} : vector<32x128xbf16>, vector<128x256xbf16>, vector<32x256xf32> -> vector<32x256xf32>
    %c0_21 = arith.constant 0 : index
    %c0_22 = arith.constant 0 : index
    %25 = vector.load %arg10[%c0_21, %c0_22] : memref<1x256xf32, #tpu.memory_space<vmem>>, vector<1x256xf32>
    %26 = vector.broadcast %25 : vector<1x256xf32> to vector<32x256xf32>
    %27 = arith.addf %24, %26 : vector<32x256xf32>
    %28 = vector.extract_strided_slice %27 {offsets = [0, 0], sizes = [32, 128], strides = [1, 1]} : vector<32x256xf32> to vector<32x128xf32>
    %29 = vector.extract_strided_slice %27 {offsets = [0, 128], sizes = [32, 128], strides = [1, 1]} : vector<32x256xf32> to vector<32x128xf32>
    %cst_23 = arith.constant 0.000000e+00 : f32
    %30 = vector.broadcast %cst_23 : f32 to vector<32x128xf32>
    %31 = arith.maximumf %29, %30 : vector<32x128xf32>
    %32 = math.absf %29 : vector<32x128xf32>
    %cst_24 = arith.constant 0.000000e+00 : f32
    %33 = vector.broadcast %cst_24 : f32 to vector<32x128xf32>
    %34 = arith.subf %33, %32 : vector<32x128xf32>
    %35 = math.exp %34 : vector<32x128xf32>
    %36 = math.log1p %35 : vector<32x128xf32>
    %37 = arith.addf %31, %36 : vector<32x128xf32>
    %cst_25 = arith.constant 1.000000e-01 : f32
    %38 = vector.broadcast %cst_25 : f32 to vector<32x128xf32>
    %39 = arith.addf %37, %38 : vector<32x128xf32>
    %c0_26 = arith.constant 0 : index
    %c0_27 = arith.constant 0 : index
    %40 = vector.load %arg4[%c0_26, %c0_27] : memref<32x128xbf16, #tpu.memory_space<vmem>>, vector<32x128xbf16>
    %41 = arith.extf %40 : vector<32x128xbf16> to vector<32x128xf32>
    %42 = arith.mulf %39, %41 : vector<32x128xf32>
    %43 = arith.addf %28, %42 : vector<32x128xf32>
    %44 = arith.truncf %28 : vector<32x128xf32> to vector<32x128xbf16>
    %c0_28 = arith.constant 0 : index
    %c0_29 = arith.constant 0 : index
    %45 = vector.load %arg11[%c0_28, %c0_29] : memref<32x384xbf16, #tpu.memory_space<vmem>>, vector<32x128xbf16>
    tpu.vector_store %arg11[%c0_28, %c0_29], %44 {strides = array<i32>} : memref<32x384xbf16, #tpu.memory_space<vmem>>, vector<32x128xbf16>,
    %46 = arith.truncf %39 : vector<32x128xf32> to vector<32x128xbf16>
    %c0_30 = arith.constant 0 : index
    %c128 = arith.constant 128 : index
    %47 = vector.load %arg11[%c0_30, %c128] : memref<32x384xbf16, #tpu.memory_space<vmem>>, vector<32x128xbf16>
    tpu.vector_store %arg11[%c0_30, %c128], %46 {strides = array<i32>} : memref<32x384xbf16, #tpu.memory_space<vmem>>, vector<32x128xbf16>,
    %48 = arith.truncf %43 : vector<32x128xf32> to vector<32x128xbf16>
    %c0_31 = arith.constant 0 : index
    %c256 = arith.constant 256 : index
    %49 = vector.load %arg11[%c0_31, %c256] : memref<32x384xbf16, #tpu.memory_space<vmem>>, vector<32x128xbf16>
    tpu.vector_store %arg11[%c0_31, %c256], %48 {strides = array<i32>} : memref<32x384xbf16, #tpu.memory_space<vmem>>, vector<32x128xbf16>,
    return
  }
  func.func @transform_0(%arg0: i32) -> (i32, i32) {
    %c0_i32 = arith.constant 0 : i32
    %c0_i32_0 = arith.constant 0 : i32
    return %arg0, %c0_i32 : i32, i32
  }
  func.func @transform_1(%arg0: i32) -> (i32, i32) {
    %c0_i32 = arith.constant 0 : i32
    %c0_i32_0 = arith.constant 0 : i32
    return %arg0, %c0_i32 : i32, i32
  }
  func.func @transform_2(%arg0: i32) -> (i32, i32) {
    %c0_i32 = arith.constant 0 : i32
    %c0_i32_0 = arith.constant 0 : i32
    return %arg0, %c0_i32 : i32, i32
  }
  func.func @transform_3(%arg0: i32) -> (i32, i32) {
    %c0_i32 = arith.constant 0 : i32
    %c0_i32_0 = arith.constant 0 : i32
    return %arg0, %c0_i32 : i32, i32
  }
  func.func @transform_4(%arg0: i32) -> (i32, i32) {
    %c0_i32 = arith.constant 0 : i32
    %c0_i32_0 = arith.constant 0 : i32
    %c0_i32_1 = arith.constant 0 : i32
    return %c0_i32, %c0_i32_0 : i32, i32
  }
  func.func @transform_5(%arg0: i32) -> (i32, i32) {
    %c0_i32 = arith.constant 0 : i32
    %c0_i32_0 = arith.constant 0 : i32
    %c0_i32_1 = arith.constant 0 : i32
    return %c0_i32, %c0_i32_0 : i32, i32
  }
  func.func @transform_6(%arg0: i32) -> (i32, i32) {
    %c0_i32 = arith.constant 0 : i32
    %c0_i32_0 = arith.constant 0 : i32
    %c0_i32_1 = arith.constant 0 : i32
    return %c0_i32, %c0_i32_0 : i32, i32
  }
  func.func @transform_7(%arg0: i32) -> (i32, i32) {
    %c0_i32 = arith.constant 0 : i32
    %c0_i32_0 = arith.constant 0 : i32
    %c0_i32_1 = arith.constant 0 : i32
    return %c0_i32, %c0_i32_0 : i32, i32
  }
  func.func @transform_8(%arg0: i32) -> (i32, i32) {
    %c0_i32 = arith.constant 0 : i32
    %c0_i32_0 = arith.constant 0 : i32
    %c0_i32_1 = arith.constant 0 : i32
    return %c0_i32, %c0_i32_0 : i32, i32
  }
  func.func @transform_9(%arg0: i32) -> (i32, i32) {
    %c0_i32 = arith.constant 0 : i32
    %c0_i32_0 = arith.constant 0 : i32
    %c0_i32_1 = arith.constant 0 : i32
    return %c0_i32, %c0_i32_0 : i32, i32
  }
  func.func @transform_10(%arg0: i32) -> (i32, i32) {
    %c0_i32 = arith.constant 0 : i32
    %c0_i32_0 = arith.constant 0 : i32
    return %arg0, %c0_i32 : i32, i32
  }
}

</mosaic_0001>

<bundles_post_ra>
// kernel: tpu_custom_call.1
= control target key start
LH: loop header
LB: loop body
LE: loop exit
PB: predicated region body
PF: predicated region fallthrough
CT: control target
= control target key end

     0   :  { %s1900_s0 = inlined_call_operand.vmem [shape: bf16[64,16], index: 0, kind: input, shape index: {}]   ;;  %s1901_s1 = inlined_call_operand.vmem [shape: bf16[64,32], index: 1, kind: input, shape index: {}]   ;;  %s1902_s2 = inlined_call_operand.vmem [shape: bf16[64,32], index: 2, kind: input, shape index: {}]   ;;  %s1903_s3 = inlined_call_operand.hbm [shape: bf16[64,128], index: 3, kind: input, shape index: {}]   ;;  %s1904_s4 = inlined_call_operand.vmem [shape: bf16[16,128], index: 4, kind: input, shape index: {}]   ;;  %s1905_s5 = inlined_call_operand.hbm [shape: bf16[32,128], index: 5, kind: input, shape index: {}]   ;;  %s1906_s6 = inlined_call_operand.hbm [shape: bf16[32,128], index: 6, kind: input, shape index: {}]   ;;  %s1907_s7 = inlined_call_operand.vmem [shape: f32[1,128], index: 7, kind: input, shape index: {}]   ;;  %s1908_s8 = inlined_call_operand.vmem [shape: bf16[128,256], index: 8, kind: input, shape index: {}]   ;;  %s1909_s9 = inlined_call_operand.vmem [shape: f32[1,256], index: 9, kind: input, shape index: {}]   ;;  %s1910_s10 = inlined_call_operand.hbm [shape: bf16[64,384], index: 10, kind: output, shape index: {}]  }
   0x1   :  { %1914 = sst [smem:[#allocation14_spill]] %s1905_s5 }
   0x2   :  { %1915 = sst [smem:[#allocation15_spill]] %s1906_s6 }
   0x3   :  { %15 = vsyncpa [#allocation3], 0 }
   0x4   :  { %17 = vsyncpa [#allocation3 + $0x1], 0 }
   0x5   :  { %18 = vsyncpa [#allocation6], 0 }
   0x6   :  { %19 = vsyncpa [#allocation4], 0 }
   0x7   :  { %21 = vsyncpa [#allocation4 + $0x1], 0  ;;  %s1583_s13 = smov 0   ;;  %s1585_s14 = smov 0  }
   0x8   :  { %s1587_s15 = smov 0   ;;  %s1589_s16 = smov 0  }
   0x9 LB: > { %1916 = sst [smem:[#allocation12_spill]] %s1516_s15  ;;  %s1604_s17 = sadd.s32 4294967295, %s1520_s16   ;;  %s1520_s16 = sphi %s1589_s16, %s1932_s16   ;;  %s1516_s15 = sphi %s1587_s15, %s1929_s15   ;;  %s1512_s14 = sphi %s1585_s14, %s1931_s14   ;;  %s1508_s13 = sphi %s1583_s13, %s1930_s13  }
   0xa   : > { %s1068_s18 = sadd.s32 4294967294, %s1520_s16   ;;  %p125_p0 = scmp.ne.s32.totalorder %s1512_s14, %s1508_s13 }
   0xb   : > { %p126_p1 = scmp.eq.s32.totalorder %s1604_s17, 0  ;;  %p275_p2 = scmp.eq.s32.totalorder %s1604_s17, 1 }
   0xc   : > { %p281_p3 = scmp.eq.s32.totalorder %s1068_s18, 1  ;;  %p1069_p5 = scmp.ge.s32.totalorder %s1520_s16, 1 }
   0xd   : > { %p1613_p4 = por %p126_p1, %p125_p0  ;;  %p288_p7 = scmp.lt.s32.totalorder %s1520_s16, 3 }
   0xe   : > { %p1618_p6 = por %p281_p3, %p125_p0  ;;  %s1919_s5 = sld [smem:[#allocation14_spill]] }
   0xf   : > { %p1626_p8 = pnand %p1069_p5, %p288_p7  ;;  %s1522_s25 = smov [#allocation5]  }
  0x10   : > { %s304_s26 = sshll.u32 %s1522_s25, 4  ;;  %s1921_s6 = sld [smem:[#allocation15_spill]]  ;;  %s305_s26 = int_to_ptr.vmem [resolvable:$true] %s304_s26 }
  0x11   : > { %p1276_p9 = pneg %p1626_p8  ;;  %s1911_s30 = smov 64  }
  0x12   : > { %s1912_s11 = smov 4   ;;  %s1525_s12 = smov [#allocation7]  }
  0x13   : > { %p1277_p10 = pnand %p1276_p9, %p126_p1  ;;  %s318_s18 = sshll.u32 %s1525_s12, 4  ;;  %s319_s18 = int_to_ptr.vmem [resolvable:$true] %s318_s18 }
  0x14   : > { %s302_s23 = sshll.u32 %s1919_s5, 4  ;;  %s1645_s21 = sadd.s32 1, %s1520_s16   ;;  %s303_s23 = int_to_ptr.hbm [resolvable:$true] %s302_s23 }
  0x15   : > { %1279 = dma.hbm_to_vmem [thread:$0]  (!%p1277_p10), %s303_s23, 256, %s305_s26, [#allocation6], %s1911_s30, %s1911_s30, %s1912_s11  }
  0x16   : > { %s316_s29 = sshll.u32 %s1921_s6, 4  ;;  %s112_s22 = sadd.s32 1, %s1516_s15  ;;  %s317_s29 = int_to_ptr.hbm [resolvable:$true] %s316_s29 }
  0x17   : > { %1282 = dma.hbm_to_vmem [thread:$0]  (!%p1277_p10), %s317_s29, 256, %s319_s18, [#allocation6], %s1911_s30, %s1911_s30, %s1912_s11  }
  0x18   : > { %s109_s25 = ssub.s32 %s1520_s16, %s1645_s21  ;;  %p119_p12 = scmp.ne.s32.totalorder %s1516_s15, %s1512_s14 }
  0x19   : > { %p110_p13 = scmp.eq.s32.totalorder %s109_s25, 0  ;;  %p120_p0 = scmp.eq.s32.totalorder %s1520_s16, 0 }
  0x1a   : > { %p1655_p3 = por %p275_p2, %p119_p12  ;;  %p1293_p5 = scmp.lt.s32.totalorder %s1520_s16, 2 }
  0x1b   : > { %s1661_s23 = scalar_select %p110_p13, %s1516_s15, %s112_s22  }
  0x1c   : > { %p121_p7 = por %p120_p0, %p119_p12  ;;  %s368_s26 = sand.u32 1, %s1516_s15  }
  0x1d   : > { %1923 = sst [smem:[#allocation13_spill]] %s1661_s23  ;;  %s1073_s28 = sshll.u32 %s368_s26, 4 }
  0x1e   : > { %s1209_s29 = sshll.u32 %s1520_s16, 4  ;;  %s372_s11 = scalar_lea.vmem [#allocation2], %s1073_s28 }
  0x1f   : > { %s377_s30 = scalar_lea.hbm %s1903_s3, %s1209_s29  ;;  %s380_s5 = sshll.u32 %s372_s11, 4  ;;  %s381_s5 = int_to_ptr.vmem [resolvable:$true] %s380_s5 }
  0x20   : > { %s378_s25 = sshll.u32 %s377_s30, 4  ;;  %p1668_p2 = pnand %p1293_p5, %p121_p7  ;;  %s379_s25 = int_to_ptr.hbm [resolvable:$true] %s378_s25 }
  0x21   : > { %s369_s22 = scalar_lea.sflag [#allocation3], %s368_s26  ;;  %s1420_s23 = sshra.s32 %s379_s25, 4  ;;  %s1421_s23 = int_to_ptr.hbm [resolvable:$true] %s1420_s23 }
  0x22   : > { %s1422_s15 = scalar_lea.hbm %s1421_s23, 16  ;;  %p1424_p10 = pneg %p1668_p2 }
  0x23   : > { %p1423_p9 = scmp.ne.s32.totalorder %s1421_s23, %s1422_s15  ;;  %s1427_s30 = scalar_lea.hbm %s1903_s3, 32 }
  0x24   : > { %p1428_p0 = scmp.lt.s32.totalorder %s1421_s23, %s1903_s3  ;;  %p1429_p5 = scmp.lt.s32.totalorder %s1427_s30, %s1422_s15 }
  0x25   : > { %p1425_p12 = pnand %p1424_p10, %p1423_p9 }
  0x26   : > { %p1430_p7 = por %p1429_p5, %p1428_p0 }
  0x27   : > { %p1426_p13 = pneg %p1425_p12 }
  0x29   : > { %p1431_p11 = pnand %p1430_p7, %p1426_p13 }
  0x2b   : > { %1434 = shalt.err (!%p1431_p11)
}
  0x2c   : > { %s1925_s26 = smov 4   ;;  %s1926_s18 = smov 64  }
  0x2d   : > { %1286 = dma.hbm_to_vmem [thread:$0]  (!%p1668_p2), %s379_s25, 256, %s381_s5, %s369_s22, %s1926_s18, %s1926_s18, %s1925_s26  }
  0x2e   : > { %392 = sbr.rel (%p1626_p8) target bundleno = 414 (0x19e), region = 60  ;;  %s1688_s29 = sand.u32 (!%p1626_p8), 1, %s1512_s14  }
  0x2f   : > { %s1077_s23 = sshll.u32 (!%p1626_p8), %s1688_s29, 4  ;;  %s395_s15 = scalar_lea.sflag (!%p1626_p8), [#allocation3], %s1688_s29 }
  0x30   : > { %s1692_s28 = scalar_lea.vmem (!%p1626_p8), [#allocation2], %s1077_s23 }
  0x33   : > { %1495 = dma.done.wait (%p1613_p4), %s395_s15, 256  }
  0x34   : > { %1497 = vsyncadd (%p1613_p4), %s395_s15, 4294967040 }
  0x35   : > { %1499 = dma.done.wait (%p126_p1), [#allocation6], 512  }
  0x36   : > { %1501 = vsyncadd (%p126_p1), [#allocation6], 4294966784  ;;  %s1080_s5 = sshll.u32 %s1604_s17, 2  ;;  %v1216_v0 = vld [vmem:[#allocation5 + $0x8] sm:$0xff]  ;;  %v1212_v1 = vld [vmem:[%s1904_s4] sm:$0xff]  ;;  %vm560_vm0 = vcmask 130048  }
  0x37   : > { %p462_p8 = scmp.lt.s32.totalorder %s1080_s5, 7  ;;  %v1220_v2 = vld [vmem:[#allocation7 + $0x8] sm:$0xff]  ;;  %531 = vmatpush.bf16.msra.mxu0 %v1216_v0  ;;  %574 = vmatpush.bf16.msra.mxu1 %v1212_v1  ;;  %v1215_v4 = vld [vmem:[#allocation5] sm:$0xff]  ;;  %v1219_v5 = vld [vmem:[#allocation7] sm:$0xff]  ;;  %vm518_vm1 = vcmask 261120   ;;  %s1470_s24 = scalar_lea.hbm %s1910_s10, 96 }
  0x38   : > { %628 = vmatpush.bf16.msra.mxu2 %v1220_v2  ;;  %v1198_v11 = vld [vmem:[%s1908_s8 + $0x70] sm:$0xf]  ;;  %v1236_v12 = vld [vmem:[%s1908_s8 + $0x74] sm:$0xf0]  ;;  %v1235_v13 = vld [vmem:[%s1908_s8 + $0x74] sm:$0xf] }
  0x39   : > { %s1934_s5 = smov (!%p462_p8, %s1080_s5), 7  ;;  %v1199_v14 = vor.u32 %v1236_v12, %v1198_v11  ;;  %v1200_v15 = vld [vmem:[%s1908_s8 + $0x78] sm:$0xf0]  ;;  %v1190_v17 = vld [vmem:[%s1908_s8 + $0x60] sm:$0xf] }
  0x3a   : > { %s1081_s6 = sshll.u32 %s1934_s5, 2  ;;  %v1203_v16 = vor.u32 %v1235_v13, %v1200_v15  ;;  %v1234_v18 = vld [vmem:[%s1908_s8 + $0x64] sm:$0xf0]  ;;  %v1233_v19 = vld [vmem:[%s1908_s8 + $0x64] sm:$0xf] }
  0x3b   : > { %s465_s22 = scalar_lea.vmem %s1900_s0, %s1081_s6  ;;  %s471_s26 = scalar_lea.vmem %s1901_s1, %s1081_s6  ;;  %532 = vmatpush.bf16.msra.mxu0 %v1215_v4  ;;  %1246 = vmatpush.bf16.msra.mxu3 %v1199_v14  ;;  %v1191_v20 = vor.u32 %v1234_v18, %v1190_v17  ;;  %v1192_v21 = vld [vmem:[%s1908_s8 + $0x68] sm:$0xf0]  ;;  %v1182_v23 = vld [vmem:[%s1908_s8 + $0x50] sm:$0xf]  ;;  %v1232_v24 = vld [vmem:[%s1908_s8 + $0x54] sm:$0xf0] }
  0x3c   : > { %v1210_v3 = vld [vmem:[%s465_s22] sm:$0xff]  ;;  %s477_s15 = scalar_lea.vmem %s1902_s2, %s1081_s6  ;;  %629 = vmatpush.bf16.msra.mxu2 %v1219_v5  ;;  %v1211_v8 = vld [vmem:[%s465_s22 + $0x8] sm:$0xff]  ;;  %1254 = vmatpush.bf16.msrb.mxu1 %v1203_v16  ;;  %v1195_v22 = vor.u32 %v1233_v19, %v1192_v21  ;;  %v1231_v25 = vld [vmem:[%s1908_s8 + $0x54] sm:$0xf]  ;;  %v1183_v26 = vor.u32 %v1232_v24, %v1182_v23  ;;  %s1262_s6 = smul.u32 48, %s1688_s29 }
  0x3d   : > { %1116 = vmatmul.msk.bf16.vlgmr.msra.gmra.mxu1 %vm560_vm0, %v1210_v3  ;;  %v1213_v6 = vld [vmem:[%s471_s26] sm:$0xff]  ;;  %v1214_v9 = vld [vmem:[%s471_s26 + $0x8] sm:$0xff]  ;;  %v1184_v27 = vld [vmem:[%s1908_s8 + $0x58] sm:$0xf0]  ;;  %s924_s26 = scalar_lea.sflag [#allocation4], %s1688_s29 }
  0x3e   : > { %v1217_v7 = vld [vmem:[%s477_s15] sm:$0xff]  ;;  %1102 = vmatmul.msk.bf16.vlgmr.msra.gmra.mxu0 %vm518_vm1, %v1213_v6  ;;  %v1218_v10 = vld [vmem:[%s477_s15 + $0x8] sm:$0xff]  ;;  %v1187_v28 = vor.u32 %v1231_v25, %v1184_v27  ;;  %v1166_v35 = vld [vmem:[%s1908_s8 + $0x30] sm:$0xf]  ;;  %s1824_s30 = scalar_lea.vmem [#allocation8], %s1262_s6 }
  0x3f   : > { %1134 = vmatmul.msk.bf16.vlgmr.msra.gmra.mxu2 %vm518_vm1, %v1217_v7  ;;  %800 = vmatpush.bf16.msrb.mxu0 %v1203_v16  ;;  %v1174_v29 = vld [vmem:[%s1908_s8 + $0x40] sm:$0xf]  ;;  %v1230_v30 = vld [vmem:[%s1908_s8 + $0x44] sm:$0xf0]  ;;  %v1229_v31 = vld [vmem:[%s1908_s8 + $0x44] sm:$0xf] }
  0x40   : > { %781 = vmatpush.bf16.msrb.mxu2 %v1199_v14  ;;  %1247 = vmatpush.bf16.msra.mxu3 %v1191_v20  ;;  %v1175_v32 = vor.u32 %v1230_v30, %v1174_v29  ;;  %v1176_v33 = vld [vmem:[%s1908_s8 + $0x48] sm:$0xf0]  ;;  %v1228_v36 = vld [vmem:[%s1908_s8 + $0x34] sm:$0xf0]  ;;  %v1227_v37 = vld [vmem:[%s1908_s8 + $0x34] sm:$0xf] }
  0x41   : > { %1255 = vmatpush.bf16.msrb.mxu1 %v1195_v22  ;;  %v1179_v34 = vor.u32 %v1229_v31, %v1176_v33  ;;  %v1167_v38 = vor.u32 %v1228_v36, %v1166_v35  ;;  %v1168_v39 = vld [vmem:[%s1908_s8 + $0x38] sm:$0xf0]  ;;  %v1158_v41 = vld [vmem:[%s1908_s8 + $0x20] sm:$0xf]  ;;  %v1226_v42 = vld [vmem:[%s1908_s8 + $0x24] sm:$0xf0] }
  0x42   : > { %v1171_v40 = vor.u32 %v1227_v37, %v1168_v39  ;;  %v1225_v43 = vld [vmem:[%s1908_s8 + $0x24] sm:$0xf]  ;;  %v1159_v44 = vor.u32 %v1226_v42, %v1158_v41  ;;  %v1160_v45 = vld [vmem:[%s1908_s8 + $0x28] sm:$0xf0]  ;;  %v1150_v47 = vld [vmem:[%s1908_s8 + $0x10] sm:$0xf] }
  0x43   : > { %801 = vmatpush.bf16.msrb.mxu0 %v1195_v22  ;;  %v1163_v46 = vor.u32 %v1225_v43, %v1160_v45  ;;  %v1224_v48 = vld [vmem:[%s1908_s8 + $0x14] sm:$0xf0]  ;;  %v1223_v49 = vld [vmem:[%s1908_s8 + $0x14] sm:$0xf]  ;;  %v1152_v51 = vld [vmem:[%s1908_s8 + $0x18] sm:$0xf0] }
  0x44   : > { %782 = vmatpush.bf16.msrb.mxu2 %v1191_v20  ;;  %1248 = vmatpush.bf16.msra.mxu3 %v1183_v26  ;;  %v1151_v50 = vor.u32 %v1224_v48, %v1150_v47  ;;  %v1155_v52 = vor.u32 %v1223_v49, %v1152_v51  ;;  %v1142_v53 = vld [vmem:[%s1908_s8] sm:$0xf]  ;;  %v1222_v54 = vld [vmem:[%s1908_s8 + $0x4] sm:$0xf0]  ;;  %v1221_v55 = vld [vmem:[%s1908_s8 + $0x4] sm:$0xf] }
  0x45   : > { %1256 = vmatpush.bf16.msrb.mxu1 %v1187_v28  ;;  %v1143_v57 = vor.u32 %v1222_v54, %v1142_v53  ;;  %v1144_v58 = vld [vmem:[%s1908_s8 + $0x8] sm:$0xf0]  ;;  %v1335_v62 = vld [vmem:[%s1907_s7] ss:$0 sm:$0xff] }
  0x46   : > { %v1147_v60 = vor.u32 %v1221_v55, %v1144_v58  ;;  %v695_v42 = vld [vmem:[%s1909_s9] sm:$0x3] }
  0x47   : > { %802 = vmatpush.bf16.msrb.mxu0 %v1187_v28  ;;  %v698_v43 = vperm.slane %v695_v42, 1  ;;  %v697_v47 = vperm.slane %v695_v42, 0 }
  0x48   : > { %783 = vmatpush.bf16.msrb.mxu2 %v1183_v26  ;;  %1249 = vmatpush.bf16.msra.mxu3 %v1175_v32 }
  0x49   : > { %1257 = vmatpush.bf16.msrb.mxu1 %v1179_v34 }
  0x4b   : > { %803 = vmatpush.bf16.msrb.mxu0 %v1179_v34 }
  0x4c   : > { %784 = vmatpush.bf16.msrb.mxu2 %v1175_v32  ;;  %1250 = vmatpush.bf16.msra.mxu3 %v1167_v38 }
  0x4d   : > { %1117 = vmatmul.msk.bf16.gmra.mxu1 %vm560_vm0, %v1211_v8 }
  0x4e   : > { %1103 = vmatmul.msk.bf16.gmra.mxu0 %vm518_vm1, %v1214_v9  ;;  %1258 = vmatpush.bf16.msrb.mxu1 %v1171_v40 }
  0x4f   : > { %1135 = vmatmul.msk.bf16.gmra.mxu2 %vm518_vm1, %v1218_v10  ;;  %804 = vmatpush.bf16.msrb.mxu0 %v1171_v40 }
  0x50   : > { %785 = vmatpush.bf16.msrb.mxu2 %v1167_v38  ;;  %1251 = vmatpush.bf16.msra.mxu3 %v1159_v44 }
  0x52   : > { %1259 = vmatpush.bf16.msrb.mxu1 %v1163_v46 }
  0x53   : > { %805 = vmatpush.bf16.msrb.mxu0 %v1163_v46 }
  0x54   : > { %786 = vmatpush.bf16.msrb.mxu2 %v1159_v44  ;;  %1252 = vmatpush.bf16.msra.mxu3 %v1151_v50 }
  0x56   : > { %1260 = vmatpush.bf16.msrb.mxu1 %v1155_v52 }
  0x57   : > { %806 = vmatpush.bf16.msrb.mxu0 %v1155_v52 }
  0x58   : > { %787 = vmatpush.bf16.msrb.mxu2 %v1151_v50  ;;  %1253 = vmatpush.bf16.msra.mxu3 %v1143_v57 }
  0x5a   : > { %1261 = vmatpush.bf16.msrb.mxu1 %v1147_v60 }
  0x5b   : > { %807 = vmatpush.bf16.msrb.mxu0 %v1147_v60 }
  0x5c   : > { %788 = vmatpush.bf16.msrb.mxu2 %v1143_v57 }
  0xba   : > { %v576_v56 = vpop.f32.mrf.mxu1 }
  0xbb   : > { %v534_v59 = vpop.f32.mrf.mxu0 }
  0xbc   : > { %v577_v61 = vadd.f32 %v576_v56, %v534_v59 }
  0xc2   : > { %v631_v63 = vpop.f32.mrf.mxu2  ;;  %v578_v2 = vpop.f32.mrf.mxu1 }
  0xc3   : > { %v641_v0 = vadd.f32 %v631_v63, %v577_v61  ;;  %v536_v1 = vpop.f32.mrf.mxu0 }
  0xc4   : > { %v579_v5 = vadd.f32 %v578_v2, %v536_v1 }
  0xc5   : > { %v649_v3 = vadd.f32 %v1335_v62, %v641_v0 }
  0xc7   : > { %v657_v4 = vmin.f32 %v649_v3, 0.0  ;;  %vm653_vm2 = vcmp.gt.f32.partialorder %v649_v3, 0.0 }
  0xc9   : > { %v661_v7 = vmul.f32 1.442695, %v657_v4 }
  0xca   : > { %v633_v6 = vpop.f32.mrf.mxu2  ;;  %v581_v11 = vpop.f32.mrf.mxu1 }
  0xcb   : > { %v642_v8 = vadd.f32 %v633_v6, %v579_v5  ;;  %v539_v9 = vpop.f32.mrf.mxu0  ;;  %1336 = vpow2.f32 %v661_v7 }
  0xcc   : > { %v582_v13 = vadd.f32 %v581_v11, %v539_v9 }
  0xcd   : > { %v650_v10 = vadd.f32 %v1335_v62, %v642_v8 }
  0xcf   : > { %v658_v12 = vmin.f32 %v650_v10, 0.0  ;;  %vm654_vm3 = vcmp.gt.f32.partialorder %v650_v10, 0.0 }
  0xd1   : > { %v663_v14 = vmul.f32 1.442695, %v658_v12  ;;  %v1337_v17 = vpop.eup %1336 }
  0xd2   : > { %v636_v15 = vpop.f32.mrf.mxu2  ;;  %v583_v21 = vpop.f32.mrf.mxu1  ;;  %v1136_v22 = vadd.f32 -1.0, %v1337_v17 }
  0xd3   : > { %1338 = vpow2.f32 %v663_v14  ;;  %v643_v16 = vadd.f32 %v636_v15, %v582_v13  ;;  %v541_v19 = vpop.f32.mrf.mxu0 }
  0xd4   : > { %v584_v24 = vadd.f32 %v583_v21, %v541_v19  ;;  %v673_v29 = vsel %vm653_vm2, %v649_v3, %v1136_v22 }
  0xd5   : > { %v651_v18 = vadd.f32 %v1335_v62, %v643_v16  ;;  %v1238_v16 = vld [vmem:[%s1692_s28] sm:$0xff]  }
  0xd7   : > { %v659_v20 = vmin.f32 %v651_v18, 0.0  ;;  %vm655_vm4 = vcmp.gt.f32.partialorder %v651_v18, 0.0 }
  0xd9   : > { %v1339_v23 = vpop.eup %1338  ;;  %v665_v27 = vmul.f32 1.442695, %v659_v20 }
  0xda   : > { %v638_v25 = vpop.f32.mrf.mxu2  ;;  %v1137_v26 = vadd.f32 -1.0, %v1339_v23  ;;  %v1239_v23 = vunpack.c.l.bf16 %v1238_v16 }
  0xdb   : > { %v644_v28 = vadd.f32 %v638_v25, %v584_v24  ;;  %1340 = vpow2.f32 %v665_v27 }
  0xdc   : > { %v674_v30 = vsel %vm654_vm3, %v650_v10, %v1137_v26 }
  0xdd   : > { %v652_v31 = vadd.f32 %v1335_v62, %v644_v28  ;;  %v677_v32 = vpack.c.bf16 %v674_v30, %v673_v29 }
  0xdf   : > { %v660_v33 = vmin.f32 %v652_v31, 0.0  ;;  %789 = vmatmul.bf16.vlgmr.msrb.gmra.mxu2 %v677_v32  ;;  %808 = vmatmul.bf16.vlgmr.msrb.gmra.mxu0 %v677_v32  ;;  %vm656_vm5 = vcmp.gt.f32.partialorder %v652_v31, 0.0 }
  0xe1   : > { %v667_v34 = vmul.f32 1.442695, %v660_v33  ;;  %v1341_v35 = vpop.eup %1340 }
  0xe2   : > { %v1138_v36 = vadd.f32 -1.0, %v1341_v35 }
  0xe3   : > { %1342 = vpow2.f32 %v667_v34 }
  0xe4   : > { %v675_v39 = vsel %vm655_vm4, %v651_v18, %v1138_v36 }
  0xe9   : > { %v1343_v37 = vpop.eup %1342 }
  0xea   : > { %v1139_v38 = vadd.f32 -1.0, %v1343_v37 }
  0xec   : > { %v676_v40 = vsel %vm656_vm5, %v652_v31, %v1139_v38 }
  0xed   : > { %v678_v41 = vpack.c.bf16 %v676_v40, %v675_v39 }
  0xef   : > { %794 = vmatmul.bf16.vlgmr.msra.gmra.mxu3 %v678_v41  ;;  %813 = vmatmul.bf16.vlgmr.msrb.gmra.mxu1 %v678_v41 }
 0x15c   : > { %v809_v44 = vpop.f32.mrf.mxu0 }
 0x15d   : > { %v810_v45 = vadd.f32 %v809_v44, %v698_v43 }
 0x15f   : > { %v823_v46 = vand.u32 2147483647, %v810_v45  ;;  %v819_v19 = vmax.f32 %v810_v45, 0.0  ;;  %v1240_v45 = vunpack.c.h.bf16 %v1238_v16 }
 0x161   : > { %v827_v48 = vsub.f32 0.0, %v823_v46 }
 0x162   : > { %v790_v49 = vpop.f32.mrf.mxu2 }
 0x163   : > { %v831_v50 = vmul.f32 1.442695, %v827_v48  ;;  %v1818_v51 = vadd.f32 %v790_v49, %v697_v47 }
 0x164   : > { %v811_v52 = vpop.f32.mrf.mxu0 }
 0x165   : > { %1344 = vpow2.f32 %v831_v50  ;;  %v899_v53 = vpack.c.bf16 %v1818_v51, %v1818_v51  ;;  %v1822_v54 = vadd.f32 %v811_v52, %v698_v43 }
 0x167   : > { %903 = vst [vmem:[%s1824_s30] sm:$0xf] %v899_v53  ;;  %v824_v55 = vand.u32 2147483647, %v1822_v54  ;;  %v820_v41 = vmax.f32 %v1822_v54, 0.0 }
 0x169   : > { %v828_v56 = vsub.f32 0.0, %v824_v55 }
 0x16a   : > { %v792_v57 = vpop.f32.mrf.mxu2 }
 0x16b   : > { %v1345_v58 = vpop.eup %1344  ;;  %v833_v59 = vmul.f32 1.442695, %v828_v56  ;;  %v1828_v60 = vadd.f32 %v792_v57, %v697_v47  ;;  %v1245_v56 = vld [vmem:[%s1692_s28 + $0x8] sm:$0xff]   ;;  %s1263_s28 = smul.u32 48, %s1604_s17  ;;  %s937_s17 = sshll.u32 %s1824_s30, 4  ;;  %s938_s17 = int_to_ptr.vmem [resolvable:$true] %s937_s17 }
 0x16c   : > { %v839_v61 = vadd.f32 1.0, %v1345_v58  ;;  %v842_v62 = vmul.f32 -0.5, %v1345_v58  ;;  %v814_v63 = vpop.f32.mrf.mxu1  ;;  %v845_v5 = vand.u32 2147483647, %v1345_v58 }
 0x16d   : > { %1346 = vpow2.f32 %v833_v59  ;;  %v900_v0 = vpack.c.bf16 %v1828_v60, %v1828_v60  ;;  %v1832_v1 = vadd.f32 %v814_v63, %v698_v43  ;;  %s936_s22 = scalar_lea.hbm %s1910_s10, %s1263_s28 }
 0x16e   : > { %1348 = vlog2.f32 %v839_v61  ;;  %v843_v3 = vadd.f32 1.0, %v842_v62  ;;  %vm846_vm6 = vcmp.lt.f32.partialorder %v845_v5, 0.0004427343  ;;  %s939_s12 = sshll.u32 %s936_s22, 4  ;;  %s940_s12 = int_to_ptr.hbm [resolvable:$true] %s939_s12 }
 0x16f   : > { %904 = vst [vmem:[%s1824_s30 + $0xc] sm:$0xf] %v900_v0  ;;  %v825_v2 = vand.u32 2147483647, %v1832_v1  ;;  %v821_v59 = vmax.f32 %v1832_v1, 0.0  ;;  %v1243_v0 = vunpack.c.l.bf16 %v1245_v56  ;;  %s1464_s18 = sshra.s32 %s940_s12, 4  ;;  %s1465_s18 = int_to_ptr.hbm [resolvable:$true] %s1464_s18 }
 0x170   : > { %v844_v11 = vmul.f32 %v1345_v58, %v843_v3  ;;  %s1466_s23 = scalar_lea.hbm %s1465_s18, 48  ;;  %p1471_p2 = scmp.lt.s32.totalorder %s1465_s18, %s1910_s10 }
 0x171   : > { %v829_v4 = vsub.f32 0.0, %v825_v2  ;;  %p1467_p1 = scmp.ne.s32.totalorder %s1465_s18, %s1466_s23  ;;  %p1472_p9 = scmp.lt.s32.totalorder %s1470_s24, %s1466_s23 }
 0x172   : > { %v795_v6 = vpop.f32.mrf.mxu3 }
 0x173   : > { %v1347_v7 = vpop.eup %1346  ;;  %v835_v8 = vmul.f32 1.442695, %v829_v4  ;;  %v1836_v9 = vadd.f32 %v795_v6, %v697_v47  ;;  %p1468_p4 = pnand %p1467_p1, %p1655_p3  ;;  %p1473_p10 = por %p1472_p9, %p1471_p2 }
 0x174   : > { %v1349_v10 = vpop.eup %1348  ;;  %v848_v12 = vadd.f32 1.0, %v1347_v7  ;;  %v851_v13 = vmul.f32 -0.5, %v1347_v7  ;;  %v816_v14 = vpop.f32.mrf.mxu1  ;;  %v854_v27 = vand.u32 2147483647, %v1347_v7 }
 0x175   : > { %v841_v15 = vmul.f32 0.6931472, %v1349_v10  ;;  %1350 = vpow2.f32 %v835_v8  ;;  %v901_v17 = vpack.c.bf16 %v1836_v9, %v1836_v9  ;;  %v1841_v18 = vadd.f32 %v816_v14, %v698_v43  ;;  %p1469_p11 = pneg %p1468_p4 }
 0x176   : > { %1352 = vlog2.f32 %v848_v12  ;;  %v852_v24 = vadd.f32 1.0, %v851_v13  ;;  %vm855_vm7 = vcmp.lt.f32.partialorder %v854_v27, 0.0004427343  ;;  %v1244_v14 = vunpack.c.h.bf16 %v1245_v56 }
 0x177   : > { %v847_v20 = vsel %vm846_vm6, %v844_v11, %v841_v15  ;;  %905 = vst [vmem:[%s1824_s30 + $0x18] sm:$0xf] %v901_v17  ;;  %v826_v21 = vand.u32 2147483647, %v1841_v18  ;;  %v822_v10 = vmax.f32 %v1841_v18, 0.0  ;;  %p1474_p12 = pnand %p1473_p10, %p1469_p11 }
 0x178   : > { %v875_v22 = vadd.f32 %v847_v20, %v819_v19  ;;  %v853_v35 = vmul.f32 %v1347_v7, %v852_v24 }
 0x179   : > { %v830_v25 = vsub.f32 0.0, %v826_v21 }
 0x17a   : > { %v879_v26 = vadd.f32 0.1, %v875_v22  ;;  %v797_v28 = vpop.f32.mrf.mxu3 }
 0x17b   : > { %v1351_v29 = vpop.eup %1350  ;;  %v837_v30 = vmul.f32 1.442695, %v830_v25  ;;  %v1845_v31 = vadd.f32 %v797_v28, %v697_v47 }
 0x17c   : > { %v1353_v32 = vpop.eup %1352  ;;  %v907_v33 = vpack.c.bf16 %v879_v26, %v879_v26  ;;  %v891_v34 = vmul.f32 %v1239_v23, %v879_v26  ;;  %v857_v36 = vadd.f32 1.0, %v1351_v29  ;;  %v860_v38 = vmul.f32 -0.5, %v1351_v29 }
 0x17d   : > { %v850_v37 = vmul.f32 0.6931472, %v1353_v32  ;;  %1354 = vpow2.f32 %v837_v30  ;;  %v902_v39 = vpack.c.bf16 %v1845_v31, %v1845_v31  ;;  %v863_v48 = vand.u32 2147483647, %v1351_v29 }
 0x17e   : > { %911 = vst [vmem:[%s1824_s30 + $0x4] sm:$0xf] %v907_v33  ;;  %v895_v40 = vadd.f32 %v891_v34, %v1818_v51  ;;  %1356 = vlog2.f32 %v857_v36  ;;  %v861_v46 = vadd.f32 1.0, %v860_v38 }
 0x17f   : > { %v856_v42 = vsel %vm855_vm7, %v853_v35, %v850_v37  ;;  %906 = vst [vmem:[%s1824_s30 + $0x24] sm:$0xf] %v902_v39  ;;  %vm864_vm8 = vcmp.lt.f32.partialorder %v863_v48, 0.0004427343 }
 0x180   : > { %v915_v43 = vpack.c.bf16 %v895_v40, %v895_v40  ;;  %v876_v44 = vadd.f32 %v856_v42, %v820_v41  ;;  %v862_v55 = vmul.f32 %v1351_v29, %v861_v46 }
 0x182   : > { %919 = vst [vmem:[%s1824_s30 + $0x8] sm:$0xf] %v915_v43  ;;  %v880_v47 = vadd.f32 0.1, %v876_v44 }
 0x183   : > { %v1355_v49 = vpop.eup %1354 }
 0x184   : > { %v1357_v50 = vpop.eup %1356  ;;  %v908_v52 = vpack.c.bf16 %v880_v47, %v880_v47  ;;  %v892_v53 = vmul.f32 %v1240_v45, %v880_v47  ;;  %v866_v51 = vadd.f32 1.0, %v1355_v49  ;;  %v869_v57 = vmul.f32 -0.5, %v1355_v49 }
 0x185   : > { %v859_v54 = vmul.f32 0.6931472, %v1357_v50  ;;  %v872_v4 = vand.u32 2147483647, %v1355_v49 }
 0x186   : > { %912 = vst [vmem:[%s1824_s30 + $0x10] sm:$0xf] %v908_v52  ;;  %v896_v58 = vadd.f32 %v892_v53, %v1828_v60  ;;  %1358 = vlog2.f32 %v866_v51  ;;  %v870_v2 = vadd.f32 1.0, %v869_v57 }
 0x187   : > { %v865_v61 = vsel %vm864_vm8, %v862_v55, %v859_v54  ;;  %vm873_vm9 = vcmp.lt.f32.partialorder %v872_v4, 0.0004427343 }
 0x188   : > { %v916_v62 = vpack.c.bf16 %v896_v58, %v896_v58  ;;  %v877_v63 = vadd.f32 %v865_v61, %v821_v59  ;;  %v871_v60 = vmul.f32 %v1355_v49, %v870_v2 }
 0x18a   : > { %920 = vst [vmem:[%s1824_s30 + $0x14] sm:$0xf] %v916_v62  ;;  %v881_v3 = vadd.f32 0.1, %v877_v63 }
 0x18c   : > { %v1359_v5 = vpop.eup %1358  ;;  %v909_v6 = vpack.c.bf16 %v881_v3, %v881_v3  ;;  %v893_v7 = vmul.f32 %v1243_v0, %v881_v3 }
 0x18d   : > { %v868_v8 = vmul.f32 0.6931472, %v1359_v5 }
 0x18e   : > { %913 = vst [vmem:[%s1824_s30 + $0x1c] sm:$0xf] %v909_v6  ;;  %v897_v1 = vadd.f32 %v893_v7, %v1836_v9 }
 0x18f   : > { %v874_v11 = vsel %vm873_vm9, %v871_v60, %v868_v8 }
 0x190   : > { %v917_v12 = vpack.c.bf16 %v897_v1, %v897_v1  ;;  %v878_v13 = vadd.f32 %v874_v11, %v822_v10 }
 0x192   : > { %921 = vst [vmem:[%s1824_s30 + $0x20] sm:$0xf] %v917_v12  ;;  %v882_v15 = vadd.f32 0.1, %v878_v13 }
 0x194   : > { %v910_v16 = vpack.c.bf16 %v882_v15, %v882_v15  ;;  %v894_v17 = vmul.f32 %v1244_v14, %v882_v15 }
 0x196   : > { %914 = vst [vmem:[%s1824_s30 + $0x28] sm:$0xf] %v910_v16  ;;  %v898_v9 = vadd.f32 %v894_v17, %v1845_v31 }
 0x198   : > { %v918_v18 = vpack.c.bf16 %v898_v9, %v898_v9 }
 0x19a   : > { %922 = vst [vmem:[%s1824_s30 + $0x2c] sm:$0xf] %v918_v18 }
 0x19b   : > { %1477 = shalt.err (!%p1474_p12)
}
 0x19c   : > { %s1526_s29 = smov 192   ;;  %s1527_s30 = smov 12  }
 0x19d   : > { %1274 = dma.vmem_to_hbm [thread:$0]  (%p1655_p3), %s938_s17, 768, %s940_s12, %s924_s26, %s1526_s29, %s1526_s29, %s1527_s30  }
 0x19e PF: > { %s954_s28 = sand.u32 1, %s1508_s13   ;;  %p1927_p13 = scmp.ge.s32.totalorder %s1520_s16, 2 }
 0x19f   : > { %s955_s11 = scalar_lea.sflag [#allocation4], %s954_s28 }
 0x1a0   : > { %p1288_p0 = pnand %p1927_p13, %p1618_p6 }
 0x1a2   : > { %p1289_p5 = pneg %p1288_p0 }
 0x1a4   : > { %1503 = dma.done.wait (%p1289_p5), %s955_s11, 768  }
 0x1a5   : > { %1505 = vsyncadd (%p1289_p5), %s955_s11, 4294966528  ;;  %s1928_s19 = sld [smem:[#allocation12_spill]]  ;;  %p24_p7 = scmp.ge.s32.totalorder %s1645_s21, 4  }
 0x1a6   : > { %s1929_s15 = sld [smem:[#allocation13_spill]]  ;;  %s1930_s13 = smov %s1512_s14 }
 0x1a7   : > { %s1932_s16 = smov %s1645_s21  ;;  %26 = sbr.rel (!%p24_p7) target bundleno = 9 (0x9), region = 122 }
 0x1ab   : > { %s1931_s14 = smov %s1928_s19 }
 0x1ac   :  { %961 = vsyncpa [#allocation3], 1 }
 0x1ad   :  { %963 = vsyncpa [#allocation3 + $0x1], 1 }
 0x1ae   :  { %964 = vsyncpa [#allocation6], 1 }
 0x1af   :  { %965 = vsyncpa [#allocation4], 1 }
 0x1b0   :  { %967 = vsyncpa [#allocation4 + $0x1], 1 }

</bundles_post_ra>
